<compile_context>
chip_gen: v7x
topology: tpu7x:2x2x1
jax: 0.10.0
libtpu: 0.0.40
codegen_flags: <defaults>
</compile_context>

<pallas_src>
import functools
import math

import jax
import jax.numpy as jnp
from jax import lax
from jax.experimental import pallas as pl
from jax.experimental.pallas import tpu as pltpu


def _loss_kernel(gamma, predict_ref, label_ref, logpi_ref, baseline_ref, out_ref):
    """One batch-block of the fused LOSS.forward (t == T branch).

    predict_ref : (1, bn) VMEM  -- ACTION-head logits, batch on the lane axis
    label_ref   : (1, bn) VMEM  -- 0/1 targets
    logpi_ref   : (T, bn) VMEM  -- per-step log pi, time on sublanes
    baseline_ref: (1,)   SMEM   -- learned baseline scalar
    out_ref     : (4,)   SMEM   -- [a_loss, l_loss, b_loss, R.sum()], resident
                                   across the batch grid (accumulated).
    """
    x = predict_ref[...].astype(jnp.float32)
    y = label_ref[...].astype(jnp.float32)
    lp = logpi_ref[...].astype(jnp.float32)
    baseline = baseline_ref[0]

    # ---- reward: (sigmoid(x) > 0.5) == (x > 0); exact 0/1 float equality
    # against the labels, exactly like the reference.
    pred_cls = (x > 0.0).astype(jnp.float32)
    R = (y == pred_cls).astype(jnp.float32)                       # (1, bn)

    # ---- a_loss: BCEWithLogitsLoss(reduction='sum'), stable formulation.
    a_loss = jnp.sum(jnp.maximum(x, 0.0) - x * y
                     + jnp.log(1.0 + jnp.exp(-jnp.abs(x))))

    # ---- l_loss: REINFORCE; the reference's reversed python loop puts weight
    # gamma^(T-1-t) on step t.  gamma is static, so edge cases are trace-time.
    T = lp.shape[0]
    t_idx = lax.broadcasted_iota(jnp.int32, (T, 1), 0)
    if gamma == 1.0:                                              # static branch
        disc = jnp.ones((T, 1), jnp.float32)
    elif gamma == 0.0:                                            # static branch
        disc = (t_idx == T - 1).astype(jnp.float32)
    else:
        expo = float(T - 1) - t_idx.astype(jnp.float32)
        disc = jnp.exp(expo * math.log(gamma))                    # gamma^(T-1-t)

    # (R - baseline).detach() is a no-op in the forward pass.
    # TODO(synk): wrap R_b in lax.stop_gradient if a custom_vjp is ever added.
    R_b = R - baseline                                            # (1, bn)
    l_loss = -jnp.sum(disc * lp * R_b)

    b_loss = jnp.sum((baseline - R) ** 2)
    r_sum = jnp.sum(R)

    @pl.when(pl.program_id(0) == 0)
    def _():
        out_ref[0] = jnp.float32(0.0)
        out_ref[1] = jnp.float32(0.0)
        out_ref[2] = jnp.float32(0.0)
        out_ref[3] = jnp.float32(0.0)

    out_ref[0] += a_loss
    out_ref[1] += l_loss
    out_ref[2] += b_loss
    out_ref[3] += r_sum


def _pick_batch_block(B, T, itemsize=4, tile_budget_bytes=4 << 20):
    """Largest lane-aligned batch block whose (T, bn) logpi tile fits budget."""
    if B % 128 != 0:
        # Small / non-lane-aligned batches: single whole-array block.
        # TODO(synk): pad huge non-128-multiple batches instead of whole-array.
        return B
    for bn in (4096, 2048, 1024, 512, 256, 128):
        if B % bn == 0 and T * bn * itemsize <= tile_budget_bytes:
            return bn
    return 128


def loss_forward(predict, label, logpi_stack, baseline, *, gamma):
    """LOSS.forward at t == T.  Returns (a_loss, l_loss, b_loss, R.sum()).

    predict     : (B, 1) logits from the ACTION head
    label       : (B, 1) 0/1 targets
    logpi_stack : (T, B, 1) per-step log-probabilities stacked over the episode
    baseline    : (1, 1) learned baseline parameter
    """
    # NOTE: the PyTorch module's per-step statefulness (self.t counter, the
    # self.logpi list, the `return (None,)*4` for t < T) is handled here by
    # stacking logpi over the episode and calling the fused kernel once.
    B = predict.shape[0]
    T = logpi_stack.shape[0]

    # Free, order-preserving reshapes only (no transpose / concat / copies):
    # batch lands on the 128-lane axis, time on the sublane axis.
    predict_row = predict.reshape(1, B)
    label_row = label.reshape(1, B)
    logpi_tb = logpi_stack.reshape(T, B)
    baseline_s = baseline.astype(jnp.float32).reshape(1)

    bn = _pick_batch_block(B, T, itemsize=logpi_tb.dtype.itemsize)
    grid = (B // bn,)

    kernel = functools.partial(_loss_kernel, float(gamma))
    out = pl.pallas_call(
        kernel,
        grid=grid,
        out_shape=jax.ShapeDtypeStruct((4,), jnp.float32),
        in_specs=[
            pl.BlockSpec((1, bn), lambda i: (0, i)),              # predict row
            pl.BlockSpec((1, bn), lambda i: (0, i)),              # label row
            pl.BlockSpec((T, bn), lambda i: (0, i)),              # logpi (T, B)
            pl.BlockSpec(memory_space=pltpu.MemorySpace.SMEM),    # baseline (1,)
        ],
        out_specs=pl.BlockSpec(memory_space=pltpu.MemorySpace.SMEM),
        compiler_params=pltpu.CompilerParams(
            # The batch-block axis reduces into the resident SMEM output.
            dimension_semantics=("arbitrary",),
        ),
    )(predict_row, label_row, logpi_tb, baseline_s)

    return out[0], out[1], out[2], out[3]


def reference_forward(predict, label, logpi_stack, baseline, *, gamma):
    """Pure-JAX reference mirroring the PyTorch LOSS.forward (t == T branch)."""
    x, y = predict, label
    pred_cls = (jax.nn.sigmoid(x) > 0.5).astype(jnp.float32)
    R = (y == pred_cls).astype(jnp.float32).squeeze(-1)           # (B,)

    a_loss = jnp.sum(jnp.maximum(x, 0.0) - x * y
                     + jnp.log(1.0 + jnp.exp(-jnp.abs(x))))

    l_loss = jnp.float32(0.0)
    R_b = R - baseline[0, 0]
    for lp in reversed(list(logpi_stack)):                        # lp: (B, 1)
        l_loss = l_loss + (-(lp.sum(-1) * R_b).sum())
        R_b = gamma * R_b

    b_loss = jnp.sum((baseline[0, 0] - R) ** 2)
    return a_loss, l_loss, b_loss, R.sum()


if __name__ == "__main__":
    GAMMA = 0.9
    names = ("a_loss", "l_loss", "b_loss", "R_sum")

    def run_case(B, T, key):
        k1, k2, k3 = jax.random.split(key, 3)
        predict = jax.random.normal(k1, (B, 1), jnp.float32)                    # ACTION logits
        label = (jax.random.uniform(k2, (B, 1)) > 0.5).astype(jnp.float32)      # 0/1 targets
        logpi_stack = jax.random.normal(k3, (T, B, 1), jnp.float32) * 0.3 - 1.0 # per-step log pi
        baseline = 0.1 * jnp.ones((1, 1), jnp.float32)                          # LOSS.baseline init

        outs = jax.block_until_ready(
            loss_forward(predict, label, logpi_stack, baseline, gamma=GAMMA))
        refs = reference_forward(predict, label, logpi_stack, baseline, gamma=GAMMA)
        for name, got, want in zip(names, outs, refs):
            assert bool(jnp.all(jnp.isfinite(got))), (B, T, name)
            assert bool(jnp.allclose(got, want, rtol=1e-4, atol=1e-4)), (
                B, T, name, float(got), float(want))

    key = jax.random.PRNGKey(0)
    k_small, k_big = jax.random.split(key)
    run_case(B=2, T=6, key=k_small)    # small episode: single whole-array block
    run_case(B=384, T=4, key=k_big)    # lane-aligned batch: gridded path (3 blocks)

    print("KERNEL_OK")
</pallas_src>

<mosaic_0001>
module attributes {stable_mosaic.version = 11 : i64} {
  func.func @_loss_kernel(%arg0: i32, %arg1: memref<1x2xf32, #tpu.memory_space<vmem>>, %arg2: memref<1x2xf32, #tpu.memory_space<vmem>>, %arg3: memref<6x2xf32, #tpu.memory_space<vmem>>, %arg4: memref<1xf32, #tpu.memory_space<smem>>, %arg5: memref<4xf32, #tpu.memory_space<smem>>) attributes {dimension_semantics = [#tpu.dimension_semantics<arbitrary>], iteration_bounds = array<i64: 1>, scalar_prefetch = 0 : i64, scratch_operands = 0 : i64, tpu.core_type = #tpu.core_type<tc>, window_params = [{transform_indices = @transform_0, window_bounds = array<i64: 1, 2>}, {transform_indices = @transform_1, window_bounds = array<i64: 1, 2>}, {transform_indices = @transform_2, window_bounds = array<i64: 6, 2>}, {transform_indices = @transform_3, window_bounds = array<i64: 1>}, {transform_indices = @transform_4, window_bounds = array<i64: 4>}]} {
    %c0 = arith.constant 0 : index
    %c0_0 = arith.constant 0 : index
    %0 = vector.load %arg1[%c0, %c0_0] : memref<1x2xf32, #tpu.memory_space<vmem>>, vector<1x2xf32>
    %c0_1 = arith.constant 0 : index
    %c0_2 = arith.constant 0 : index
    %1 = vector.load %arg2[%c0_1, %c0_2] : memref<1x2xf32, #tpu.memory_space<vmem>>, vector<1x2xf32>
    %c0_3 = arith.constant 0 : index
    %c0_4 = arith.constant 0 : index
    %2 = vector.load %arg3[%c0_3, %c0_4] : memref<6x2xf32, #tpu.memory_space<vmem>>, vector<6x2xf32>
    %c0_5 = arith.constant 0 : index
    %3 = memref.load %arg4[%c0_5] : memref<1xf32, #tpu.memory_space<smem>>
    %cst = arith.constant 0.000000e+00 : f32
    %4 = vector.broadcast %cst : f32 to vector<1x2xf32>
    %5 = arith.cmpf ogt, %0, %4 : vector<1x2xf32>
    %6 = arith.extui %5 : vector<1x2xi1> to vector<1x2xi32>
    %7 = arith.sitofp %6 : vector<1x2xi32> to vector<1x2xf32>
    %8 = arith.cmpf oeq, %1, %7 : vector<1x2xf32>
    %9 = arith.extui %8 : vector<1x2xi1> to vector<1x2xi32>
    %10 = arith.sitofp %9 : vector<1x2xi32> to vector<1x2xf32>
    %cst_6 = arith.constant 0.000000e+00 : f32
    %11 = vector.broadcast %cst_6 : f32 to vector<1x2xf32>
    %12 = arith.maximumf %0, %11 : vector<1x2xf32>
    %13 = arith.mulf %0, %1 : vector<1x2xf32>
    %14 = arith.subf %12, %13 : vector<1x2xf32>
    %15 = math.absf %0 : vector<1x2xf32>
    %cst_7 = arith.constant 0.000000e+00 : f32
    %16 = vector.broadcast %cst_7 : f32 to vector<1x2xf32>
    %17 = arith.subf %16, %15 : vector<1x2xf32>
    %18 = math.exp %17 : vector<1x2xf32>
    %cst_8 = arith.constant 1.000000e+00 : f32
    %19 = vector.broadcast %cst_8 : f32 to vector<1x2xf32>
    %20 = arith.addf %19, %18 : vector<1x2xf32>
    %21 = math.log %20 : vector<1x2xf32>
    %22 = arith.addf %14, %21 : vector<1x2xf32>
    %23 = vector.shape_cast %22 : vector<1x2xf32> to vector<1x1x2xf32>
    %cst_9 = arith.constant dense<0.000000e+00> : vector<1xf32>
    %24 = vector.multi_reduction <add>, %23, %cst_9 [1, 2] : vector<1x1x2xf32> to vector<1xf32>
    %25 = vector.shape_cast %24 : vector<1xf32> to vector<1x1x1xf32>
    %26 = vector.extract %25[0, 0, 0] : f32 from vector<1x1x1xf32>
    %27 = tpu.iota {dimensions = array<i32: 0>} : vector<6x1xi32>
    %28 = arith.sitofp %27 : vector<6x1xi32> to vector<6x1xf32>
    %cst_10 = arith.constant 5.000000e+00 : f32
    %29 = vector.broadcast %cst_10 : f32 to vector<6x1xf32>
    %30 = arith.subf %29, %28 : vector<6x1xf32>
    %cst_11 = arith.constant -0.105360515 : f32
    %31 = vector.broadcast %cst_11 : f32 to vector<6x1xf32>
    %32 = arith.mulf %30, %31 : vector<6x1xf32>
    %33 = math.exp %32 : vector<6x1xf32>
    %34 = vector.broadcast %3 : f32 to vector<1x2xf32>
    %35 = arith.subf %10, %34 : vector<1x2xf32>
    %36 = vector.broadcast %33 : vector<6x1xf32> to vector<6x2xf32>
    %37 = arith.mulf %36, %2 : vector<6x2xf32>
    %38 = vector.broadcast %35 : vector<1x2xf32> to vector<6x2xf32>
    %39 = arith.mulf %37, %38 : vector<6x2xf32>
    %40 = vector.shape_cast %39 : vector<6x2xf32> to vector<1x6x2xf32>
    %cst_12 = arith.constant dense<0.000000e+00> : vector<1xf32>
    %41 = vector.multi_reduction <add>, %40, %cst_12 [1, 2] : vector<1x6x2xf32> to vector<1xf32>
    %42 = vector.shape_cast %41 : vector<1xf32> to vector<1x1x1xf32>
    %43 = vector.extract %42[0, 0, 0] : f32 from vector<1x1x1xf32>
    %cst_13 = arith.constant 0.000000e+00 : f32
    %44 = arith.subf %cst_13, %43 : f32
    %45 = vector.broadcast %3 : f32 to vector<1x2xf32>
    %46 = arith.subf %45, %10 : vector<1x2xf32>
    %47 = arith.mulf %46, %46 : vector<1x2xf32>
    %48 = vector.shape_cast %47 : vector<1x2xf32> to vector<1x1x2xf32>
    %cst_14 = arith.constant dense<0.000000e+00> : vector<1xf32>
    %49 = vector.multi_reduction <add>, %48, %cst_14 [1, 2] : vector<1x1x2xf32> to vector<1xf32>
    %50 = vector.shape_cast %49 : vector<1xf32> to vector<1x1x1xf32>
    %51 = vector.extract %50[0, 0, 0] : f32 from vector<1x1x1xf32>
    %52 = vector.shape_cast %10 : vector<1x2xf32> to vector<1x1x2xf32>
    %cst_15 = arith.constant dense<0.000000e+00> : vector<1xf32>
    %53 = vector.multi_reduction <add>, %52, %cst_15 [1, 2] : vector<1x1x2xf32> to vector<1xf32>
    %54 = vector.shape_cast %53 : vector<1xf32> to vector<1x1x1xf32>
    %55 = vector.extract %54[0, 0, 0] : f32 from vector<1x1x1xf32>
    %c0_i32 = arith.constant 0 : i32
    %56 = arith.cmpi eq, %arg0, %c0_i32 : i32
    %57 = arith.extui %56 : i1 to i32
    %c0_i32_16 = arith.constant 0 : i32
    %58 = arith.cmpi ne, %57, %c0_i32_16 : i32
    scf.if %58 {
      %cst_22 = arith.constant 0.000000e+00 : f32
      %c0_23 = arith.constant 0 : index
      %71 = memref.load %arg5[%c0_23] : memref<4xf32, #tpu.memory_space<smem>>
      memref.store %cst_22, %arg5[%c0_23] : memref<4xf32, #tpu.memory_space<smem>>
      %cst_24 = arith.constant 0.000000e+00 : f32
      %c1_25 = arith.constant 1 : index
      %72 = memref.load %arg5[%c1_25] : memref<4xf32, #tpu.memory_space<smem>>
      memref.store %cst_24, %arg5[%c1_25] : memref<4xf32, #tpu.memory_space<smem>>
      %cst_26 = arith.constant 0.000000e+00 : f32
      %c2_27 = arith.constant 2 : index
      %73 = memref.load %arg5[%c2_27] : memref<4xf32, #tpu.memory_space<smem>>
      memref.store %cst_26, %arg5[%c2_27] : memref<4xf32, #tpu.memory_space<smem>>
      %cst_28 = arith.constant 0.000000e+00 : f32
      %c3_29 = arith.constant 3 : index
      %74 = memref.load %arg5[%c3_29] : memref<4xf32, #tpu.memory_space<smem>>
      memref.store %cst_28, %arg5[%c3_29] : memref<4xf32, #tpu.memory_space<smem>>
    } else {
    }
    %c0_17 = arith.constant 0 : index
    %59 = memref.load %arg5[%c0_17] : memref<4xf32, #tpu.memory_space<smem>>
    %60 = arith.addf %59, %26 : f32
    %c0_18 = arith.constant 0 : index
    %61 = memref.load %arg5[%c0_18] : memref<4xf32, #tpu.memory_space<smem>>
    memref.store %60, %arg5[%c0_18] : memref<4xf32, #tpu.memory_space<smem>>
    %c1 = arith.constant 1 : index
    %62 = memref.load %arg5[%c1] : memref<4xf32, #tpu.memory_space<smem>>
    %63 = arith.addf %62, %44 : f32
    %c1_19 = arith.constant 1 : index
    %64 = memref.load %arg5[%c1_19] : memref<4xf32, #tpu.memory_space<smem>>
    memref.store %63, %arg5[%c1_19] : memref<4xf32, #tpu.memory_space<smem>>
    %c2 = arith.constant 2 : index
    %65 = memref.load %arg5[%c2] : memref<4xf32, #tpu.memory_space<smem>>
    %66 = arith.addf %65, %51 : f32
    %c2_20 = arith.constant 2 : index
    %67 = memref.load %arg5[%c2_20] : memref<4xf32, #tpu.memory_space<smem>>
    memref.store %66, %arg5[%c2_20] : memref<4xf32, #tpu.memory_space<smem>>
    %c3 = arith.constant 3 : index
    %68 = memref.load %arg5[%c3] : memref<4xf32, #tpu.memory_space<smem>>
    %69 = arith.addf %68, %55 : f32
    %c3_21 = arith.constant 3 : index
    %70 = memref.load %arg5[%c3_21] : memref<4xf32, #tpu.memory_space<smem>>
    memref.store %69, %arg5[%c3_21] : memref<4xf32, #tpu.memory_space<smem>>
    return
  }
  func.func @transform_0(%arg0: i32) -> (i32, i32) {
    %c0_i32 = arith.constant 0 : i32
    %c0_i32_0 = arith.constant 0 : i32
    return %c0_i32, %arg0 : i32, i32
  }
  func.func @transform_1(%arg0: i32) -> (i32, i32) {
    %c0_i32 = arith.constant 0 : i32
    %c0_i32_0 = arith.constant 0 : i32
    return %c0_i32, %arg0 : i32, i32
  }
  func.func @transform_2(%arg0: i32) -> (i32, i32) {
    %c0_i32 = arith.constant 0 : i32
    %c0_i32_0 = arith.constant 0 : i32
    return %c0_i32, %arg0 : i32, i32
  }
  func.func @transform_3(%arg0: i32) -> i32 {
    %c0_i32 = arith.constant 0 : i32
    %c0_i32_0 = arith.constant 0 : i32
    return %c0_i32 : i32
  }
  func.func @transform_4(%arg0: i32) -> i32 {
    %c0_i32 = arith.constant 0 : i32
    %c0_i32_0 = arith.constant 0 : i32
    return %c0_i32 : i32
  }
}

</mosaic_0001>

<bundles_post_ra>
// kernel: tpu_custom_call.1
= control target key start
LH: loop header
LB: loop body
LE: loop exit
PB: predicated region body
PF: predicated region fallthrough
CT: control target
= control target key end

     0   :  { %v51_v2 = vlaneseq  ;;  %v177_v4 = vmov 0.0   ;;  %s231_s0 = inlined_call_operand.vmem [shape: f32[1,2], index: 0, kind: input, shape index: {}]   ;;  %s232_s1 = inlined_call_operand.vmem [shape: f32[1,2], index: 1, kind: input, shape index: {}]   ;;  %s233_s2 = inlined_call_operand.vmem [shape: f32[6,2], index: 2, kind: input, shape index: {}]   ;;  %s234_s3 = inlined_call_operand.<no memory space> [shape: f32[1], index: 3, kind: input, shape index: {}]   ;;  %s235_s4 = inlined_call_operand.hbm [shape: f32[4], index: 4, kind: output, shape index: {}]  }
   0x1   :  { %v19_v0 = vld [vmem:[%s231_s0] sm:$0x1]  ;;  %v58_v6 = vstv %s234_s3 }
   0x2   :  { %v20_v1 = vld [vmem:[%s232_s1] sm:$0x1]  ;;  %vm23_vm0 = vcmp.gt.f32.partialorder %v19_v0, 0.0  ;;  %v32_v3 = vand.u32 2147483647, %v19_v0  ;;  %v52_v7 = vshrl.u32 %v51_v2, 7 }
   0x3   :  { %v143_v5 = vsel %vm23_vm0, 1.0, %v177_v4 }
   0x4   :  { %10 = vsyncpa [#allocation4], 0  ;;  %vm26_vm1 = vcmp.eq.f32.partialorder %v20_v1, %v143_v5  ;;  %v33_v8 = vsub.f32 0.0, %v32_v3  ;;  %v53_v10 = vcvt.s32.f32 %v52_v7  ;;  %vm40_vm2 = vcmask 8192   ;;  %v21_v26 = vld [vmem:[%s233_s2] sm:$0x3f] }
   0x5   :  { %v144_v9 = vsel %vm26_vm1, 1.0, %v177_v4  ;;  %v29_v22 = vmax.f32 %v19_v0, 0.0  ;;  %v30_v23 = vmul.f32 %v20_v1, %v19_v0  ;;  %v64_v24 = vsub.s32 0, %v52_v7  ;;  %s165_s26 = scalar_lea.hbm %s235_s4, 16 }
   0x6   :  { %v80_v11 = vsub.f32 %v58_v6, %v144_v9  ;;  %v34_v12 = vmul.f32 1.442695, %v33_v8  ;;  %v54_v13 = vsub.f32 5.0, %v53_v10  ;;  %v92_v17 = vsel %vm40_vm2, %v144_v9, 0.0  ;;  %p166_p0 = scmp.ne.s32.totalorder %s235_s4, %s165_s26  ;;  %p169_p1 = scmp.lt.u32.totalorder %s165_s26, %s235_s4 }
   0x7   :  { %v59_v21 = vsub.f32 %v144_v9, %v58_v6  ;;  %v31_v27 = vsub.f32 %v29_v22, %v30_v23  ;;  %vm68_vm3 = vcmask 13312  }
   0x8   :  { %v81_v14 = vmul.f32 %v80_v11, %v80_v11  ;;  %159 = vpow2.f32 %v34_v12  ;;  %v55_v15 = vmul.f32 -0.105360515, %v54_v13  ;;  %p171_p2 = pnand %p169_p1, %p166_p0 }
   0x9   :  { %v65_v29 = vrot.slane %v59_v21, %v64_v24 }
   0xa   :  { %v82_v16 = vsel %vm40_vm2, %v81_v14, 0.0  ;;  %v56_v18 = vmul.f32 1.442695, %v55_v15 }
   0xb   :  { %83 = vadd.xlane.f32.xlu1 %v82_v16 }
   0xc   :  { %161 = vpow2.f32 %v56_v18 }
   0xf   :  { %93 = vadd.xlane.f32.xlu1 %v92_v17 }
  0x12   :  { %v160_v19 = vpop.eup %159 }
  0x13   :  { %v36_v20 = vadd.f32 1.0, %v160_v19 }
  0x15   :  { %163 = vlog2.f32 %v36_v20 }
  0x16   :  { %v162_v25 = vpop.eup %161 }
  0x17   :  { %v60_v28 = vmul.f32 %v162_v25, %v21_v26 }
  0x19   :  { %v67_v33 = vmul.f32 %v65_v29, %v60_v28 }
  0x1b   :  { %v69_v35 = vsel %vm68_vm3, %v67_v33, 0.0 }
  0x1f   :  { %v164_v30 = vpop.eup %163 }
  0x20   :  { %v38_v31 = vmul.f32 0.6931472, %v164_v30 }
  0x22   :  { %v39_v32 = vadd.f32 %v38_v31, %v31_v27 }
  0x24   :  { %v41_v34 = vsel %vm40_vm2, %v39_v32, 0.0 }
  0x25   :  { %42 = vadd.xlane.f32.xlu0 %v41_v34 }
  0x29   :  { %70 = vadd.xlane.f32.xlu0 %v69_v35 }
  0x98   :  { %v84_v36 = vpop.xlane.xlu1 %83 }
  0x99   :  { %v85_v38 = vrot.slane %v84_v36, 4 }
  0x9b   :  { %v86_v40 = vadd.f32 %v85_v38, %v84_v36 }
  0x9c   :  { %v94_v37 = vpop.xlane.xlu1 %93 }
  0x9d   :  { %v95_v39 = vrot.slane %v94_v37, 4  ;;  %v87_v45 = vrot.slane %v86_v40, 2 }
  0x9f   :  { %v96_v43 = vadd.f32 %v95_v39, %v94_v37  ;;  %v88_v52 = vadd.f32 %v87_v45, %v86_v40 }
  0xa1   :  { %v97_v48 = vrot.slane %v96_v43, 2  ;;  %v89_v58 = vrot.slane %v88_v52, 1 }
  0xa3   :  { %v98_v53 = vadd.f32 %v97_v48, %v96_v43  ;;  %v90_v62 = vadd.f32 %v89_v58, %v88_v52 }
  0xa5   :  { %v99_v60 = vrot.slane %v98_v53, 1 }
  0xa7   :  { %v100_v63 = vadd.f32 %v99_v60, %v98_v53 }
  0xb2   :  { %v43_v41 = vpop.xlane.xlu0 %42 }
  0xb3   :  { %v44_v42 = vrot.slane %v43_v41, 4 }
  0xb5   :  { %v45_v44 = vadd.f32 %v44_v42, %v43_v41 }
  0xb6   :  { %v71_v46 = vpop.xlane.xlu0 %70 }
  0xb7   :  { %v46_v47 = vrot.slane %v45_v44, 2  ;;  %v72_v49 = vrot.slane %v71_v46, 4 }
  0xb9   :  { %v73_v50 = vadd.f32 %v72_v49, %v71_v46  ;;  %v47_v51 = vadd.f32 %v46_v47, %v45_v44 }
  0xbb   :  { %v74_v54 = vrot.slane %v73_v50, 2  ;;  %v48_v55 = vrot.slane %v47_v51, 1 }
  0xbd   :  { %v75_v56 = vadd.f32 %v74_v54, %v73_v50  ;;  %v49_v57 = vadd.f32 %v48_v55, %v47_v51 }
  0xbf   :  { %148 = vpush %v49_v57  ;;  %v76_v59 = vrot.slane %v75_v56, 1 }
  0xc1   :  { %v77_v61 = vadd.f32 %v76_v59, %v75_v56 }
  0xc3   :  { %150 = vpush %v77_v61 }
  0xc4   :  { %152 = vpush %v90_v62 }
  0xc5   :  { %154 = vpush %v100_v63 }
  0xf0   :  { %s149_s2 = spop %148 }
  0xf1   :  { %117 = sst [smem:[#allocation3]] %s149_s2 }
  0xf4   :  { %s151_s3 = spop %150 }
  0xf5   :  { %s79_s21 = ssub.f32 0.0, %s151_s3  ;;  %s153_s22 = spop %152 }
  0xf6   :  { %s155_s23 = spop %154  ;;  %125 = sst [smem:[#allocation3 + $0x2]] %s153_s22 }
  0xf7   :  { %121 = sst [smem:[#allocation3 + $0x1]] %s79_s21 }
  0xf8   :  { %129 = sst [smem:[#allocation3 + $0x3]] %s155_s23 }
  0xf9   :  { %174 = shalt.err (!%p171_p2)
}
  0xfa   :  { %s178_s5 = smov [#allocation3]  }
  0xfb   :  { %137 = dma.smem_to_hbm %s178_s5, 16, %s235_s4, [#allocation4]  }
  0xfc   :  { %175 = dma.done.wait [#allocation4], 16  }
  0xfd   :  { %176 = vsyncadd [#allocation4], 4294967280 }
  0xfe   :  { %141 = sfence }
  0xff   :  { %142 = vsyncpa [#allocation4], 1 }

</bundles_post_ra>
